<compile_context>
chip_gen: v5e
topology: v5e:2x2
jax: 0.10.0
libtpu: 0.0.40
codegen_flags: <defaults>
</compile_context>

<pallas_src>
import functools

import jax
import jax.numpy as jnp
import numpy as np
from jax.experimental import pallas as pl
from jax.experimental.pallas import tpu as pltpu

# ----------------------------- config (cfg) -----------------------------
NUM_CLASSES = 3
NUM_ANC = 5
S_ = 1 + NUM_CLASSES                     # conf + classes = 4
D = S_ + 4                               # per-anchor prediction width = 8
GDIM = 1 + NUM_CLASSES + 4 + 1 + 4       # MODE_TRAIN != 4 gt width = 13
LOSS_WEIGHT = (1.0, 1.0, 1.0, 1.0, 1.0)
ALPHA = 0.5                              # focalloss alpha passed in forward
EPS16 = float(np.finfo(np.float16).eps)  # torch.finfo(torch.float16).eps
LOG_EPS = float(np.log(EPS16))
LOG_1MEPS = float(np.log1p(-EPS16))
NSTATS = 10
STATS_PAD = 128                          # lane-dense output row


def _rsum(x):
    """Per-image sum over (channel, position) of (BB, C, N) -> (BB, 1, 1)."""
    return jnp.sum(jnp.sum(x, axis=-1, keepdims=True), axis=-2, keepdims=True)


def _rmax(x):
    return jnp.max(jnp.max(x, axis=-1, keepdims=True), axis=-2, keepdims=True)


def _rmin(x):
    return jnp.min(jnp.min(x, axis=-1, keepdims=True), axis=-2, keepdims=True)


def _softplus(x):
    # stable softplus without log1p (clamps downstream reproduce torch eps behavior)
    return jnp.maximum(x, 0.0) + jnp.log(1.0 + jnp.exp(-jnp.abs(x)))


# ----------------------------- Pallas kernel -----------------------------
def _yolo2_stats_kernel(p_ref, g_ref, w_ref, o_ref):
    """Per-image partial reductions on a lane-dense channel-major layout.

    p_ref: (BB, D, N)  raw predictions (pre-sigmoid), channels [conf, cls*3, txty, twth]
    g_ref: (BB, D, N)  matched GT, channels [conf, cls*3, txty, twth]
    w_ref: (BB, 1, N)  GT box-area weight channel (gyolos[..., s_+4+1])
    o_ref: (BB, 1, 128) [num_pos, num_neg, sum_lpos, sum_lneg,
                         sum_cls, sum_txty, sum_twth, p_max, p_min, p_sum, 0...]
    """
    f32 = jnp.float32

    gconf = g_ref[:, 0:1, :].astype(f32)                    # (BB,1,N)
    fpos = (gconf > 0.0).astype(f32)
    fneg = (gconf == 0.0).astype(f32)
    num_pos = _rsum(fpos)
    num_neg = _rsum(fneg)

    # ---- conf focal loss (pos / neg; ignore excluded via masks) ----
    x_conf = p_ref[:, 0:1, :].astype(f32)                   # (BB,1,N)
    sp = _softplus(x_conf)
    log_pc = x_conf - sp                                    # log(sigmoid(x))
    log_1mpc = -sp                                          # log(1 - sigmoid(x))
    pc = jnp.exp(log_pc)                                    # sigmoid(x), once
    # Reproduce torch `pconf.clamp(eps16, 1-eps16)` exactly (clamps are cheap VPU ops):
    pc_cl = jnp.clip(pc, EPS16, 1.0 - EPS16)
    log_pc_cl = jnp.clip(log_pc, LOG_EPS, LOG_1MEPS)
    log_1mpc_cl = jnp.clip(log_1mpc, LOG_EPS, LOG_1MEPS)
    one_m = 1.0 - pc_cl
    sum_lpos = _rsum(-ALPHA * one_m * one_m * log_pc_cl * fpos)
    sum_lneg = _rsum(-(1.0 - ALPHA) * pc_cl * pc_cl * log_1mpc_cl * fneg)

    # ---- cls BCE over positives (logits-form == -(g*log s + (1-g)*log(1-s))) ----
    x_cls = p_ref[:, 1:S_, :].astype(f32)                   # (BB,3,N)
    g_cls = g_ref[:, 1:S_, :].astype(f32)
    bce_cls = jnp.maximum(x_cls, 0.0) - x_cls * g_cls + _softplus(-jnp.abs(x_cls))
    sum_cls = _rsum(bce_cls * fpos)

    # ---- txty BCE * weight over positives ----
    wgt = w_ref[...].astype(f32)                            # (BB,1,N)
    wpos = wgt * fpos
    x_xy = p_ref[:, S_:S_ + 2, :].astype(f32)               # (BB,2,N)
    g_xy = g_ref[:, S_:S_ + 2, :].astype(f32)
    bce_xy = jnp.maximum(x_xy, 0.0) - x_xy * g_xy + _softplus(-jnp.abs(x_xy))
    sum_txty = _rsum(bce_xy * wpos)

    # ---- twth MSE * weight over positives ----
    p_wh = p_ref[:, S_ + 2:S_ + 4, :].astype(f32)
    g_wh = g_ref[:, S_ + 2:S_ + 4, :].astype(f32)
    dwh = p_wh - g_wh
    sum_twth = _rsum(dwh * dwh * wpos)

    # ---- pconf logging stats (unclamped sigmoid, like torch) ----
    p_max = _rmax(pc)
    p_min = _rmin(pc)
    p_sum = _rsum(pc)

    o_ref[...] = jnp.zeros_like(o_ref)
    o_ref[:, :, 0:1] = num_pos
    o_ref[:, :, 1:2] = num_neg
    o_ref[:, :, 2:3] = sum_lpos
    o_ref[:, :, 3:4] = sum_lneg
    o_ref[:, :, 4:5] = sum_cls
    o_ref[:, :, 5:6] = sum_txty
    o_ref[:, :, 6:7] = sum_twth
    o_ref[:, :, 7:8] = p_max
    o_ref[:, :, 8:9] = p_min
    o_ref[:, :, 9:10] = p_sum


# ----------------------------- pallas_call wrapper -----------------------------
def _run_stats(p_cm, g_cm, w_cm):
    """p_cm: (B, D, N); g_cm: (B, D, N); w_cm: (B, 1, N) -> stats (B, NSTATS)."""
    batch, d, n = p_cm.shape
    bb = batch if batch <= 16 else 16            # images per grid step
    grid = (pl.cdiv(batch, bb),)
    stats = pl.pallas_call(
        _yolo2_stats_kernel,
        grid=grid,
        in_specs=[
            pl.BlockSpec((bb, d, n), lambda b: (b, 0, 0)),
            pl.BlockSpec((bb, d, n), lambda b: (b, 0, 0)),
            pl.BlockSpec((bb, 1, n), lambda b: (b, 0, 0)),
        ],
        out_specs=pl.BlockSpec((bb, 1, STATS_PAD), lambda b: (b, 0, 0)),
        out_shape=jax.ShapeDtypeStruct((batch, 1, STATS_PAD), jnp.float32),
        compiler_params=pltpu.CompilerParams(dimension_semantics=("parallel",)),
    )(p_cm, g_cm, w_cm)
    return stats[:, 0, :NSTATS]


@jax.jit
def _yolo2_loss_core(p_cm, g_cm, w_cm):
    batch, _, n = p_cm.shape
    stats = _run_stats(p_cm, g_cm, w_cm)          # (B, 10)
    num_pos_b, num_neg_b = stats[:, 0], stats[:, 1]
    sum_lpos_b, sum_lneg_b = stats[:, 2], stats[:, 3]
    sum_cls_b, sum_txty_b, sum_twth_b = stats[:, 4], stats[:, 5], stats[:, 6]
    pmax_b, pmin_b, psum_b = stats[:, 7], stats[:, 8], stats[:, 9]

    nums_pos = jnp.maximum(num_pos_b, EPS16)      # .clamp(min=fp16 eps)
    nums_neg = jnp.maximum(num_neg_b, EPS16)
    total_pos = jnp.sum(num_pos_b)                # number of positive rows across batch

    l_cls = (jnp.sum(sum_cls_b) / total_pos) * LOSS_WEIGHT[2]
    l_conf_pos = jnp.mean(jnp.sum(sum_lpos_b) / nums_pos)
    l_conf_neg = jnp.mean(jnp.sum(sum_lneg_b) / nums_neg) * 3.0
    l_txty = jnp.sum(sum_txty_b) / total_pos
    l_twth = jnp.sum(sum_twth_b) / total_pos
    l_total = l_conf_pos + l_conf_neg + l_cls + l_txty + l_twth

    p_mean = jnp.sum(psum_b) / (batch * n)
    scalars = jnp.stack([l_total, l_conf_pos, l_conf_neg, l_cls, l_txty, l_twth,
                         jnp.max(pmax_b), jnp.min(pmin_b), p_mean])
    return l_total, scalars


def loss_yolo_v2_forward(pyolos_nchw, gyolos_cn):
    """pyolos_nchw: (B, (1+NC+4)*NUM_ANC, h, w) raw NCHW net output.
       gyolos_cn:   (B, GDIM, NUM_ANC*h*w) matched GT, channel-major, position order
                    (anchor, h*w) — i.e. the matcher output transposed once to the
                    lane-dense layout the kernel reads (in production the matcher
                    would emit this layout directly)."""
    batch, c, h, w = pyolos_nchw.shape
    assert c == D * NUM_ANC
    n = NUM_ANC * h * w
    assert gyolos_cn.shape == (batch, GDIM, n)

    # Channel-major lane-dense prediction slab straight from NCHW: pure reshape, no copy
    # (channel index = d*NUM_ANC + anc, positions = anc*h*w + hw).
    p_cm = pyolos_nchw.reshape(batch, D, n)
    # Only the GT channels this branch actually reads: [conf, cls, txty, twth] + weight.
    g_cm = gyolos_cn[:, :D, :]
    w_cm = gyolos_cn[:, S_ + 5:S_ + 6, :]

    l_total, scalars = _yolo2_loss_core(p_cm, g_cm, w_cm)
    s = np.asarray(jax.device_get(scalars))       # single host sync for all log values
    log_dict = {
        "l_total": float(s[0]),
        "l_conf_pos": float(s[1]),
        "l_conf_neg": float(s[2]),
        "l_cls": float(s[3]),
        "l_xy": float(s[4]),
        "l_wh": float(s[5]),
        "p_max": float(s[6]),
        "p_min": float(s[7]),
        "p_mean": float(s[8]),
    }
    return l_total, log_dict


# ----------------------------- main -----------------------------
if __name__ == "__main__":
    key = jax.random.PRNGKey(0)
    k1, k2, k3, k4, k5, k6, k7, k8 = jax.random.split(key, 8)

    batch, h, w = 2, 8, 8
    N = NUM_ANC * h * w

    # raw network output (pre-sigmoid logits / tw,th regressions), NCHW like PyTorch
    pyolos = 0.5 * jax.random.normal(k1, (batch, D * NUM_ANC, h, w), jnp.float32)

    # TODO(synk): fmatch4yolov2 GT matching (Python loop over variable-length per-image target
    # dicts, IoU-based anchor assignment) has no clean fixed-shape Pallas equivalent; a
    # deterministic synthetic matched-GT tensor `gyolos` is built here instead.
    u = jax.random.uniform(k2, (batch, N))
    gconf = jnp.where(u > 0.92, 1.0, jnp.where(u > 0.85, -1.0, 0.0))  # 1=pos, 0=neg, -1=ignore
    gconf = gconf.at[:, 0].set(1.0)                                   # ensure >=1 positive / image
    labels = jax.random.randint(k3, (batch, N), 0, NUM_CLASSES)
    gcls = jax.nn.one_hot(labels, NUM_CLASSES, dtype=jnp.float32)
    gtxy = jax.random.uniform(k4, (batch, N, 2))                      # cell-relative targets [0,1)
    gtwh = 0.5 * jax.random.normal(k5, (batch, N, 2))                 # log-space wh targets
    extra = jax.random.uniform(k6, (batch, N, 1))                     # slot s_+4 (unused here)
    weight = 1.0 + jax.random.uniform(k7, (batch, N, 1))              # slot s_+4+1: 2 - box-area weight
    tail = jax.random.uniform(k8, (batch, N, 3))                      # remaining slots (unused)
    gyolos = jnp.concatenate(
        [gconf[..., None], gcls, gtxy, gtwh, extra, weight, tail], axis=-1
    ).astype(jnp.float32)
    assert gyolos.shape == (batch, N, GDIM)
    # One-time transpose to the channel-major lane-dense layout the kernel consumes
    # (a production matcher would write this layout directly).
    gyolos_cn = jnp.transpose(gyolos, (0, 2, 1))                      # (B, GDIM, N)

    l_total, log_dict = loss_yolo_v2_forward(pyolos, gyolos_cn)
    jax.block_until_ready(l_total)
    assert np.isfinite(float(l_total)), "loss is not finite"
    assert all(np.isfinite(v) for v in log_dict.values()), "log values not finite"
    print("KERNEL_OK")
</pallas_src>

<mosaic_0001>
module attributes {stable_mosaic.version = 11 : i64} {
  func.func @_yolo2_stats_kernel(%arg0: i32, %arg1: memref<2x8x320xf32, #tpu.memory_space<vmem>>, %arg2: memref<2x8x320xf32, #tpu.memory_space<vmem>>, %arg3: memref<2x1x320xf32, #tpu.memory_space<vmem>>, %arg4: memref<2x1x128xf32, #tpu.memory_space<vmem>>) attributes {dimension_semantics = [#tpu.dimension_semantics<parallel>], iteration_bounds = array<i64: 1>, scalar_prefetch = 0 : i64, scratch_operands = 0 : i64, tpu.core_type = #tpu.core_type<tc>, window_params = [{transform_indices = @transform_0, window_bounds = array<i64: 2, 8, 320>}, {transform_indices = @transform_1, window_bounds = array<i64: 2, 8, 320>}, {transform_indices = @transform_2, window_bounds = array<i64: 2, 1, 320>}, {transform_indices = @transform_3, window_bounds = array<i64: 2, 1, 128>}]} {
    %c0 = arith.constant 0 : index
    %c0_0 = arith.constant 0 : index
    %c0_1 = arith.constant 0 : index
    %0 = vector.load %arg2[%c0, %c0_0, %c0_1] : memref<2x8x320xf32, #tpu.memory_space<vmem>>, vector<2x1x320xf32>
    %cst = arith.constant 0.000000e+00 : f32
    %1 = vector.broadcast %cst : f32 to vector<2x1x320xf32>
    %2 = arith.cmpf ogt, %0, %1 : vector<2x1x320xf32>
    %3 = arith.extui %2 : vector<2x1x320xi1> to vector<2x1x320xi32>
    %4 = arith.sitofp %3 : vector<2x1x320xi32> to vector<2x1x320xf32>
    %cst_2 = arith.constant 0.000000e+00 : f32
    %5 = vector.broadcast %cst_2 : f32 to vector<2x1x320xf32>
    %6 = arith.cmpf oeq, %0, %5 : vector<2x1x320xf32>
    %7 = arith.extui %6 : vector<2x1x320xi1> to vector<2x1x320xi32>
    %8 = arith.sitofp %7 : vector<2x1x320xi32> to vector<2x1x320xf32>
    %cst_3 = arith.constant dense<0.000000e+00> : vector<2x1xf32>
    %9 = vector.multi_reduction <add>, %4, %cst_3 [2] : vector<2x1x320xf32> to vector<2x1xf32>
    %10 = vector.shape_cast %9 : vector<2x1xf32> to vector<2x1x1xf32>
    %cst_4 = arith.constant dense<0.000000e+00> : vector<2x1xf32>
    %11 = vector.multi_reduction <add>, %10, %cst_4 [1] : vector<2x1x1xf32> to vector<2x1xf32>
    %12 = vector.shape_cast %11 : vector<2x1xf32> to vector<2x1x1xf32>
    %cst_5 = arith.constant dense<0.000000e+00> : vector<2x1xf32>
    %13 = vector.multi_reduction <add>, %8, %cst_5 [2] : vector<2x1x320xf32> to vector<2x1xf32>
    %14 = vector.shape_cast %13 : vector<2x1xf32> to vector<2x1x1xf32>
    %cst_6 = arith.constant dense<0.000000e+00> : vector<2x1xf32>
    %15 = vector.multi_reduction <add>, %14, %cst_6 [1] : vector<2x1x1xf32> to vector<2x1xf32>
    %16 = vector.shape_cast %15 : vector<2x1xf32> to vector<2x1x1xf32>
    %c0_7 = arith.constant 0 : index
    %c0_8 = arith.constant 0 : index
    %c0_9 = arith.constant 0 : index
    %17 = vector.load %arg1[%c0_7, %c0_8, %c0_9] : memref<2x8x320xf32, #tpu.memory_space<vmem>>, vector<2x1x320xf32>
    %cst_10 = arith.constant 0.000000e+00 : f32
    %18 = vector.broadcast %cst_10 : f32 to vector<2x1x320xf32>
    %19 = arith.maximumf %17, %18 : vector<2x1x320xf32>
    %20 = math.absf %17 : vector<2x1x320xf32>
    %cst_11 = arith.constant 0.000000e+00 : f32
    %21 = vector.broadcast %cst_11 : f32 to vector<2x1x320xf32>
    %22 = arith.subf %21, %20 : vector<2x1x320xf32>
    %23 = math.exp %22 : vector<2x1x320xf32>
    %cst_12 = arith.constant 1.000000e+00 : f32
    %24 = vector.broadcast %cst_12 : f32 to vector<2x1x320xf32>
    %25 = arith.addf %24, %23 : vector<2x1x320xf32>
    %26 = math.log %25 : vector<2x1x320xf32>
    %27 = arith.addf %19, %26 : vector<2x1x320xf32>
    %28 = arith.subf %17, %27 : vector<2x1x320xf32>
    %cst_13 = arith.constant 0.000000e+00 : f32
    %29 = vector.broadcast %cst_13 : f32 to vector<2x1x320xf32>
    %30 = arith.subf %29, %27 : vector<2x1x320xf32>
    %31 = math.exp %28 : vector<2x1x320xf32>
    %cst_14 = arith.constant 9.765625E-4 : f32
    %cst_15 = arith.constant 0.999023437 : f32
    %32 = vector.broadcast %cst_14 : f32 to vector<2x1x320xf32>
    %33 = arith.maximumf %32, %31 : vector<2x1x320xf32>
    %34 = vector.broadcast %cst_15 : f32 to vector<2x1x320xf32>
    %35 = arith.minimumf %34, %33 : vector<2x1x320xf32>
    %cst_16 = arith.constant -6.93147182 : f32
    %cst_17 = arith.constant -9.77039686E-4 : f32
    %36 = vector.broadcast %cst_16 : f32 to vector<2x1x320xf32>
    %37 = arith.maximumf %36, %28 : vector<2x1x320xf32>
    %38 = vector.broadcast %cst_17 : f32 to vector<2x1x320xf32>
    %39 = arith.minimumf %38, %37 : vector<2x1x320xf32>
    %cst_18 = arith.constant -6.93147182 : f32
    %cst_19 = arith.constant -9.77039686E-4 : f32
    %40 = vector.broadcast %cst_18 : f32 to vector<2x1x320xf32>
    %41 = arith.maximumf %40, %30 : vector<2x1x320xf32>
    %42 = vector.broadcast %cst_19 : f32 to vector<2x1x320xf32>
    %43 = arith.minimumf %42, %41 : vector<2x1x320xf32>
    %cst_20 = arith.constant 1.000000e+00 : f32
    %44 = vector.broadcast %cst_20 : f32 to vector<2x1x320xf32>
    %45 = arith.subf %44, %35 : vector<2x1x320xf32>
    %cst_21 = arith.constant -5.000000e-01 : f32
    %46 = vector.broadcast %cst_21 : f32 to vector<2x1x320xf32>
    %47 = arith.mulf %46, %45 : vector<2x1x320xf32>
    %48 = arith.mulf %47, %45 : vector<2x1x320xf32>
    %49 = arith.mulf %48, %39 : vector<2x1x320xf32>
    %50 = arith.mulf %49, %4 : vector<2x1x320xf32>
    %cst_22 = arith.constant dense<0.000000e+00> : vector<2x1xf32>
    %51 = vector.multi_reduction <add>, %50, %cst_22 [2] : vector<2x1x320xf32> to vector<2x1xf32>
    %52 = vector.shape_cast %51 : vector<2x1xf32> to vector<2x1x1xf32>
    %cst_23 = arith.constant dense<0.000000e+00> : vector<2x1xf32>
    %53 = vector.multi_reduction <add>, %52, %cst_23 [1] : vector<2x1x1xf32> to vector<2x1xf32>
    %54 = vector.shape_cast %53 : vector<2x1xf32> to vector<2x1x1xf32>
    %cst_24 = arith.constant -5.000000e-01 : f32
    %55 = vector.broadcast %cst_24 : f32 to vector<2x1x320xf32>
    %56 = arith.mulf %55, %35 : vector<2x1x320xf32>
    %57 = arith.mulf %56, %35 : vector<2x1x320xf32>
    %58 = arith.mulf %57, %43 : vector<2x1x320xf32>
    %59 = arith.mulf %58, %8 : vector<2x1x320xf32>
    %cst_25 = arith.constant dense<0.000000e+00> : vector<2x1xf32>
    %60 = vector.multi_reduction <add>, %59, %cst_25 [2] : vector<2x1x320xf32> to vector<2x1xf32>
    %61 = vector.shape_cast %60 : vector<2x1xf32> to vector<2x1x1xf32>
    %cst_26 = arith.constant dense<0.000000e+00> : vector<2x1xf32>
    %62 = vector.multi_reduction <add>, %61, %cst_26 [1] : vector<2x1x1xf32> to vector<2x1xf32>
    %63 = vector.shape_cast %62 : vector<2x1xf32> to vector<2x1x1xf32>
    %c0_27 = arith.constant 0 : index
    %c1 = arith.constant 1 : index
    %c0_28 = arith.constant 0 : index
    %64 = vector.load %arg1[%c0_27, %c1, %c0_28] : memref<2x8x320xf32, #tpu.memory_space<vmem>>, vector<2x3x320xf32>
    %c0_29 = arith.constant 0 : index
    %c1_30 = arith.constant 1 : index
    %c0_31 = arith.constant 0 : index
    %65 = vector.load %arg2[%c0_29, %c1_30, %c0_31] : memref<2x8x320xf32, #tpu.memory_space<vmem>>, vector<2x3x320xf32>
    %cst_32 = arith.constant 0.000000e+00 : f32
    %66 = vector.broadcast %cst_32 : f32 to vector<2x3x320xf32>
    %67 = arith.maximumf %64, %66 : vector<2x3x320xf32>
    %68 = arith.mulf %64, %65 : vector<2x3x320xf32>
    %69 = arith.subf %67, %68 : vector<2x3x320xf32>
    %70 = math.absf %64 : vector<2x3x320xf32>
    %cst_33 = arith.constant 0.000000e+00 : f32
    %71 = vector.broadcast %cst_33 : f32 to vector<2x3x320xf32>
    %72 = arith.subf %71, %70 : vector<2x3x320xf32>
    %cst_34 = arith.constant 0.000000e+00 : f32
    %73 = vector.broadcast %cst_34 : f32 to vector<2x3x320xf32>
    %74 = arith.maximumf %72, %73 : vector<2x3x320xf32>
    %75 = math.absf %72 : vector<2x3x320xf32>
    %cst_35 = arith.constant 0.000000e+00 : f32
    %76 = vector.broadcast %cst_35 : f32 to vector<2x3x320xf32>
    %77 = arith.subf %76, %75 : vector<2x3x320xf32>
    %78 = math.exp %77 : vector<2x3x320xf32>
    %cst_36 = arith.constant 1.000000e+00 : f32
    %79 = vector.broadcast %cst_36 : f32 to vector<2x3x320xf32>
    %80 = arith.addf %79, %78 : vector<2x3x320xf32>
    %81 = math.log %80 : vector<2x3x320xf32>
    %82 = arith.addf %74, %81 : vector<2x3x320xf32>
    %83 = arith.addf %69, %82 : vector<2x3x320xf32>
    %84 = vector.broadcast %4 : vector<2x1x320xf32> to vector<2x3x320xf32>
    %85 = arith.mulf %83, %84 : vector<2x3x320xf32>
    %cst_37 = arith.constant dense<0.000000e+00> : vector<2x3xf32>
    %86 = vector.multi_reduction <add>, %85, %cst_37 [2] : vector<2x3x320xf32> to vector<2x3xf32>
    %87 = vector.shape_cast %86 : vector<2x3xf32> to vector<2x3x1xf32>
    %cst_38 = arith.constant dense<0.000000e+00> : vector<2x1xf32>
    %88 = vector.multi_reduction <add>, %87, %cst_38 [1] : vector<2x3x1xf32> to vector<2x1xf32>
    %89 = vector.shape_cast %88 : vector<2x1xf32> to vector<2x1x1xf32>
    %c0_39 = arith.constant 0 : index
    %c0_40 = arith.constant 0 : index
    %c0_41 = arith.constant 0 : index
    %90 = vector.load %arg3[%c0_39, %c0_40, %c0_41] : memref<2x1x320xf32, #tpu.memory_space<vmem>>, vector<2x1x320xf32>
    %91 = arith.mulf %90, %4 : vector<2x1x320xf32>
    %c0_42 = arith.constant 0 : index
    %c4 = arith.constant 4 : index
    %c0_43 = arith.constant 0 : index
    %92 = vector.load %arg1[%c0_42, %c4, %c0_43] : memref<2x8x320xf32, #tpu.memory_space<vmem>>, vector<2x2x320xf32>
    %c0_44 = arith.constant 0 : index
    %c4_45 = arith.constant 4 : index
    %c0_46 = arith.constant 0 : index
    %93 = vector.load %arg2[%c0_44, %c4_45, %c0_46] : memref<2x8x320xf32, #tpu.memory_space<vmem>>, vector<2x2x320xf32>
    %cst_47 = arith.constant 0.000000e+00 : f32
    %94 = vector.broadcast %cst_47 : f32 to vector<2x2x320xf32>
    %95 = arith.maximumf %92, %94 : vector<2x2x320xf32>
    %96 = arith.mulf %92, %93 : vector<2x2x320xf32>
    %97 = arith.subf %95, %96 : vector<2x2x320xf32>
    %98 = math.absf %92 : vector<2x2x320xf32>
    %cst_48 = arith.constant 0.000000e+00 : f32
    %99 = vector.broadcast %cst_48 : f32 to vector<2x2x320xf32>
    %100 = arith.subf %99, %98 : vector<2x2x320xf32>
    %cst_49 = arith.constant 0.000000e+00 : f32
    %101 = vector.broadcast %cst_49 : f32 to vector<2x2x320xf32>
    %102 = arith.maximumf %100, %101 : vector<2x2x320xf32>
    %103 = math.absf %100 : vector<2x2x320xf32>
    %cst_50 = arith.constant 0.000000e+00 : f32
    %104 = vector.broadcast %cst_50 : f32 to vector<2x2x320xf32>
    %105 = arith.subf %104, %103 : vector<2x2x320xf32>
    %106 = math.exp %105 : vector<2x2x320xf32>
    %cst_51 = arith.constant 1.000000e+00 : f32
    %107 = vector.broadcast %cst_51 : f32 to vector<2x2x320xf32>
    %108 = arith.addf %107, %106 : vector<2x2x320xf32>
    %109 = math.log %108 : vector<2x2x320xf32>
    %110 = arith.addf %102, %109 : vector<2x2x320xf32>
    %111 = arith.addf %97, %110 : vector<2x2x320xf32>
    %112 = vector.broadcast %91 : vector<2x1x320xf32> to vector<2x2x320xf32>
    %113 = arith.mulf %111, %112 : vector<2x2x320xf32>
    %cst_52 = arith.constant dense<0.000000e+00> : vector<2x2xf32>
    %114 = vector.multi_reduction <add>, %113, %cst_52 [2] : vector<2x2x320xf32> to vector<2x2xf32>
    %115 = vector.shape_cast %114 : vector<2x2xf32> to vector<2x2x1xf32>
    %cst_53 = arith.constant dense<0.000000e+00> : vector<2x1xf32>
    %116 = vector.multi_reduction <add>, %115, %cst_53 [1] : vector<2x2x1xf32> to vector<2x1xf32>
    %117 = vector.shape_cast %116 : vector<2x1xf32> to vector<2x1x1xf32>
    %c0_54 = arith.constant 0 : index
    %c6 = arith.constant 6 : index
    %c0_55 = arith.constant 0 : index
    %118 = vector.load %arg1[%c0_54, %c6, %c0_55] : memref<2x8x320xf32, #tpu.memory_space<vmem>>, vector<2x2x320xf32>
    %c0_56 = arith.constant 0 : index
    %c6_57 = arith.constant 6 : index
    %c0_58 = arith.constant 0 : index
    %119 = vector.load %arg2[%c0_56, %c6_57, %c0_58] : memref<2x8x320xf32, #tpu.memory_space<vmem>>, vector<2x2x320xf32>
    %120 = arith.subf %118, %119 : vector<2x2x320xf32>
    %121 = arith.mulf %120, %120 : vector<2x2x320xf32>
    %122 = vector.broadcast %91 : vector<2x1x320xf32> to vector<2x2x320xf32>
    %123 = arith.mulf %121, %122 : vector<2x2x320xf32>
    %cst_59 = arith.constant dense<0.000000e+00> : vector<2x2xf32>
    %124 = vector.multi_reduction <add>, %123, %cst_59 [2] : vector<2x2x320xf32> to vector<2x2xf32>
    %125 = vector.shape_cast %124 : vector<2x2xf32> to vector<2x2x1xf32>
    %cst_60 = arith.constant dense<0.000000e+00> : vector<2x1xf32>
    %126 = vector.multi_reduction <add>, %125, %cst_60 [1] : vector<2x2x1xf32> to vector<2x1xf32>
    %127 = vector.shape_cast %126 : vector<2x1xf32> to vector<2x1x1xf32>
    %cst_61 = arith.constant dense<0xFF800000> : vector<2x1xf32>
    %128 = vector.multi_reduction <maximumf>, %31, %cst_61 [2] : vector<2x1x320xf32> to vector<2x1xf32>
    %129 = vector.shape_cast %128 : vector<2x1xf32> to vector<2x1x1xf32>
    %cst_62 = arith.constant dense<0xFF800000> : vector<2x1xf32>
    %130 = vector.multi_reduction <maximumf>, %129, %cst_62 [1] : vector<2x1x1xf32> to vector<2x1xf32>
    %131 = vector.shape_cast %130 : vector<2x1xf32> to vector<2x1x1xf32>
    %cst_63 = arith.constant dense<0x7F800000> : vector<2x1xf32>
    %132 = vector.multi_reduction <minimumf>, %31, %cst_63 [2] : vector<2x1x320xf32> to vector<2x1xf32>
    %133 = vector.shape_cast %132 : vector<2x1xf32> to vector<2x1x1xf32>
    %cst_64 = arith.constant dense<0x7F800000> : vector<2x1xf32>
    %134 = vector.multi_reduction <minimumf>, %133, %cst_64 [1] : vector<2x1x1xf32> to vector<2x1xf32>
    %135 = vector.shape_cast %134 : vector<2x1xf32> to vector<2x1x1xf32>
    %cst_65 = arith.constant dense<0.000000e+00> : vector<2x1xf32>
    %136 = vector.multi_reduction <add>, %31, %cst_65 [2] : vector<2x1x320xf32> to vector<2x1xf32>
    %137 = vector.shape_cast %136 : vector<2x1xf32> to vector<2x1x1xf32>
    %cst_66 = arith.constant dense<0.000000e+00> : vector<2x1xf32>
    %138 = vector.multi_reduction <add>, %137, %cst_66 [1] : vector<2x1x1xf32> to vector<2x1xf32>
    %139 = vector.shape_cast %138 : vector<2x1xf32> to vector<2x1x1xf32>
    %cst_67 = arith.constant 0.000000e+00 : f32
    %140 = vector.broadcast %cst_67 : f32 to vector<2x1x128xf32>
    %c0_68 = arith.constant 0 : index
    %c0_69 = arith.constant 0 : index
    %c0_70 = arith.constant 0 : index
    %141 = vector.load %arg4[%c0_68, %c0_69, %c0_70] : memref<2x1x128xf32, #tpu.memory_space<vmem>>, vector<2x1x128xf32>
    tpu.vector_store %arg4[%c0_68, %c0_69, %c0_70], %140 {strides = array<i32>} : memref<2x1x128xf32, #tpu.memory_space<vmem>>, vector<2x1x128xf32>,
    %c0_71 = arith.constant 0 : index
    %c0_72 = arith.constant 0 : index
    %c0_73 = arith.constant 0 : index
    %142 = vector.load %arg4[%c0_71, %c0_72, %c0_73] : memref<2x1x128xf32, #tpu.memory_space<vmem>>, vector<2x1x1xf32>
    tpu.vector_store %arg4[%c0_71, %c0_72, %c0_73], %12 {strides = array<i32>} : memref<2x1x128xf32, #tpu.memory_space<vmem>>, vector<2x1x1xf32>,
    %c0_74 = arith.constant 0 : index
    %c0_75 = arith.constant 0 : index
    %c1_76 = arith.constant 1 : index
    %143 = vector.load %arg4[%c0_74, %c0_75, %c1_76] : memref<2x1x128xf32, #tpu.memory_space<vmem>>, vector<2x1x1xf32>
    tpu.vector_store %arg4[%c0_74, %c0_75, %c1_76], %16 {strides = array<i32>} : memref<2x1x128xf32, #tpu.memory_space<vmem>>, vector<2x1x1xf32>,
    %c0_77 = arith.constant 0 : index
    %c0_78 = arith.constant 0 : index
    %c2 = arith.constant 2 : index
    %144 = vector.load %arg4[%c0_77, %c0_78, %c2] : memref<2x1x128xf32, #tpu.memory_space<vmem>>, vector<2x1x1xf32>
    tpu.vector_store %arg4[%c0_77, %c0_78, %c2], %54 {strides = array<i32>} : memref<2x1x128xf32, #tpu.memory_space<vmem>>, vector<2x1x1xf32>,
    %c0_79 = arith.constant 0 : index
    %c0_80 = arith.constant 0 : index
    %c3 = arith.constant 3 : index
    %145 = vector.load %arg4[%c0_79, %c0_80, %c3] : memref<2x1x128xf32, #tpu.memory_space<vmem>>, vector<2x1x1xf32>
    tpu.vector_store %arg4[%c0_79, %c0_80, %c3], %63 {strides = array<i32>} : memref<2x1x128xf32, #tpu.memory_space<vmem>>, vector<2x1x1xf32>,
    %c0_81 = arith.constant 0 : index
    %c0_82 = arith.constant 0 : index
    %c4_83 = arith.constant 4 : index
    %146 = vector.load %arg4[%c0_81, %c0_82, %c4_83] : memref<2x1x128xf32, #tpu.memory_space<vmem>>, vector<2x1x1xf32>
    tpu.vector_store %arg4[%c0_81, %c0_82, %c4_83], %89 {strides = array<i32>} : memref<2x1x128xf32, #tpu.memory_space<vmem>>, vector<2x1x1xf32>,
    %c0_84 = arith.constant 0 : index
    %c0_85 = arith.constant 0 : index
    %c5 = arith.constant 5 : index
    %147 = vector.load %arg4[%c0_84, %c0_85, %c5] : memref<2x1x128xf32, #tpu.memory_space<vmem>>, vector<2x1x1xf32>
    tpu.vector_store %arg4[%c0_84, %c0_85, %c5], %117 {strides = array<i32>} : memref<2x1x128xf32, #tpu.memory_space<vmem>>, vector<2x1x1xf32>,
    %c0_86 = arith.constant 0 : index
    %c0_87 = arith.constant 0 : index
    %c6_88 = arith.constant 6 : index
    %148 = vector.load %arg4[%c0_86, %c0_87, %c6_88] : memref<2x1x128xf32, #tpu.memory_space<vmem>>, vector<2x1x1xf32>
    tpu.vector_store %arg4[%c0_86, %c0_87, %c6_88], %127 {strides = array<i32>} : memref<2x1x128xf32, #tpu.memory_space<vmem>>, vector<2x1x1xf32>,
    %c0_89 = arith.constant 0 : index
    %c0_90 = arith.constant 0 : index
    %c7 = arith.constant 7 : index
    %149 = vector.load %arg4[%c0_89, %c0_90, %c7] : memref<2x1x128xf32, #tpu.memory_space<vmem>>, vector<2x1x1xf32>
    tpu.vector_store %arg4[%c0_89, %c0_90, %c7], %131 {strides = array<i32>} : memref<2x1x128xf32, #tpu.memory_space<vmem>>, vector<2x1x1xf32>,
    %c0_91 = arith.constant 0 : index
    %c0_92 = arith.constant 0 : index
    %c8 = arith.constant 8 : index
    %150 = vector.load %arg4[%c0_91, %c0_92, %c8] : memref<2x1x128xf32, #tpu.memory_space<vmem>>, vector<2x1x1xf32>
    tpu.vector_store %arg4[%c0_91, %c0_92, %c8], %135 {strides = array<i32>} : memref<2x1x128xf32, #tpu.memory_space<vmem>>, vector<2x1x1xf32>,
    %c0_93 = arith.constant 0 : index
    %c0_94 = arith.constant 0 : index
    %c9 = arith.constant 9 : index
    %151 = vector.load %arg4[%c0_93, %c0_94, %c9] : memref<2x1x128xf32, #tpu.memory_space<vmem>>, vector<2x1x1xf32>
    tpu.vector_store %arg4[%c0_93, %c0_94, %c9], %139 {strides = array<i32>} : memref<2x1x128xf32, #tpu.memory_space<vmem>>, vector<2x1x1xf32>,
    return
  }
  func.func @transform_0(%arg0: i32) -> (i32, i32, i32) {
    %c0_i32 = arith.constant 0 : i32
    %c0_i32_0 = arith.constant 0 : i32
    %c0_i32_1 = arith.constant 0 : i32
    return %arg0, %c0_i32, %c0_i32_0 : i32, i32, i32
  }
  func.func @transform_1(%arg0: i32) -> (i32, i32, i32) {
    %c0_i32 = arith.constant 0 : i32
    %c0_i32_0 = arith.constant 0 : i32
    %c0_i32_1 = arith.constant 0 : i32
    return %arg0, %c0_i32, %c0_i32_0 : i32, i32, i32
  }
  func.func @transform_2(%arg0: i32) -> (i32, i32, i32) {
    %c0_i32 = arith.constant 0 : i32
    %c0_i32_0 = arith.constant 0 : i32
    %c0_i32_1 = arith.constant 0 : i32
    return %arg0, %c0_i32, %c0_i32_0 : i32, i32, i32
  }
  func.func @transform_3(%arg0: i32) -> (i32, i32, i32) {
    %c0_i32 = arith.constant 0 : i32
    %c0_i32_0 = arith.constant 0 : i32
    %c0_i32_1 = arith.constant 0 : i32
    return %arg0, %c0_i32, %c0_i32_0 : i32, i32, i32
  }
}

</mosaic_0001>

<bundles_post_ra>
// kernel: _yolo2_loss_core.1
= control target key start
LH: loop header
LB: loop body
LE: loop exit
PB: predicated region body
PF: predicated region fallthrough
CT: control target
= control target key end

     0   :  { %8 = vsyncpa [#allocation3], 0  ;;  %s1283_s0 = inlined_call_operand.hbm [shape: f32[2,8,320], index: 0, kind: input, shape index: {}]   ;;  %s1284_s1 = inlined_call_operand.hbm [shape: f32[2,8,320], index: 1, kind: input, shape index: {}]   ;;  %s1285_s2 = inlined_call_operand.hbm [shape: f32[2,1,320], index: 2, kind: input, shape index: {}]   ;;  %s1286_s3 = inlined_call_operand.vmem [shape: f32[2,1,128], index: 3, kind: output, shape index: {}]  }
   0x1   :  { %9 = vsyncpa [#allocation5], 0  ;;  %s27_s14 = sshll.u32 %s1284_s1, 4  ;;  %s875_s15 = smov [#allocation4]   ;;  %s28_s14 = int_to_ptr.hbm [resolvable:$true] %s27_s14 }
   0x2   :  { %s29_s16 = sshll.u32 %s875_s15, 4  ;;  %s14_s19 = sshll.u32 %s1283_s0, 4  ;;  %s30_s16 = int_to_ptr.vmem [resolvable:$true] %s29_s16  ;;  %s15_s19 = int_to_ptr.hbm [resolvable:$true] %s14_s19 }
   0x3   :  { %s876_s20 = smov 384   ;;  %s877_s21 = smov 24  }
   0x4   :  { %35 = dma.hbm_to_vmem [thread:$0]  %s28_s14, 768, %s30_s16, [#allocation5], %s876_s20, %s876_s20, %s877_s21  }
   0x5   :  { %s878_s22 = smov [#allocation2]   ;;  %s40_s26 = sshll.u32 %s1285_s2, 4  ;;  %s41_s26 = int_to_ptr.hbm [resolvable:$true] %s40_s26 }
   0x6   :  { %s16_s23 = sshll.u32 %s878_s22, 4  ;;  %s879_s1 = smov [#allocation6]   ;;  %s17_s23 = int_to_ptr.vmem [resolvable:$true] %s16_s23 }
   0x7   :  { %22 = dma.hbm_to_vmem [thread:$0]  %s15_s19, 768, %s17_s23, [#allocation3], %s876_s20, %s876_s20, %s877_s21  }
   0x8   :  { %s42_s27 = sshll.u32 %s879_s1, 4  ;;  %s880_s28 = smov 48   ;;  %s43_s27 = int_to_ptr.vmem [resolvable:$true] %s42_s27 }
   0x9   :  { %s881_s29 = smov 3  }
   0xa   :  { %48 = dma.hbm_to_vmem [thread:$0]  %s41_s26, 96, %s43_s27, [#allocation5], %s880_s28, %s880_s28, %s881_s29  }
   0xb   :  { %871 = dma.done.wait [#allocation3], 768  }
   0xc   :  { %872 = vsyncadd [#allocation3], 4294966528 }
   0xd   :  { %873 = dma.done.wait [#allocation5], 864  }
   0xe   :  { %874 = vsyncadd [#allocation5], 4294966432  ;;  %v882_v0 = vmov 0.0   ;;  %vm90_vm0 = vcmask 1040384   ;;  %vm94_vm1 = vcmask 516096   ;;  %vm595_vm6 = vcmask 1047558  }
   0xf   :  { %689 = vst [vmem:[%s1286_s3] sm:$0x1] %v882_v0  ;;  %v61_v1 = vld [vmem:[#allocation4] ss:$8 sm:$0x7]  ;;  %v565_v20 = vld [vmem:[#allocation2] sm:$0xc0] }
  0x10   :  { %690 = vst [vmem:[%s1286_s3 + $0x1] sm:$0x1] %v882_v0  ;;  %v63_v2 = vld [vmem:[#allocation4 + $0x18] ss:$8 sm:$0x7]  ;;  %vm64_vm2 = vcmp.gt.f32.partialorder %v61_v1, 0.0 }
  0x11   :  { %vm70_vm3 = vcmp.eq.f32.partialorder %v61_v1, 0.0  ;;  %vm65_vm4 = vcmp.gt.f32.partialorder %v63_v2, 0.0  ;;  %vm71_vm5 = vcmp.eq.f32.partialorder %v63_v2, 0.0  ;;  %v918_v3 = vsel %vm64_vm2, 1.0, %v882_v0  ;;  %v402_v15 = vld [vmem:[#allocation6] sm:$0x7] }
  0x12   :  { %v920_v4 = vsel %vm70_vm3, 1.0, %v882_v0  ;;  %v922_v5 = vsel %vm65_vm4, 1.0, %v882_v0  ;;  %v924_v6 = vsel %vm71_vm5, 1.0, %v882_v0  ;;  %v78_v7 = vperm.slane %v918_v3, 0  ;;  %v566_v21 = vld [vmem:[#allocation2 + $0x8] sm:$0xc0] }
  0x13   :  { %v79_v8 = vperm.slane %v918_v3, 1  ;;  %v80_v9 = vperm.slane %v918_v3, 2  ;;  %v110_v10 = vperm.slane %v920_v4, 0  ;;  %v111_v11 = vperm.slane %v920_v4, 1  ;;  %v571_v26 = vld [vmem:[#allocation4] sm:$0xc0] }
  0x14   :  { %v112_v12 = vperm.slane %v920_v4, 2  ;;  %v81_v13 = vperm.slane %v922_v5, 0  ;;  %v82_v14 = vperm.slane %v922_v5, 1  ;;  %v91_v16 = vsel %vm90_vm0, %v78_v7, 0.0  ;;  %v572_v31 = vld [vmem:[#allocation4 + $0x8] sm:$0xc0] }
  0x15   :  { %v92_v17 = vsel %vm90_vm0, %v79_v8, 0.0  ;;  %v95_v18 = vsel %vm94_vm1, %v80_v9, 0.0  ;;  %v122_v19 = vsel %vm90_vm0, %v110_v10, 0.0  ;;  %v123_v23 = vsel %vm90_vm0, %v111_v11, 0.0  ;;  %v567_v40 = vld [vmem:[#allocation2 + $0x10] sm:$0xc0] }
  0x16   :  { %v93_v22 = vadd.f32 %v92_v17, %v91_v16  ;;  %v125_v24 = vsel %vm94_vm1, %v112_v12, 0.0  ;;  %v83_v25 = vperm.slane %v922_v5, 2  ;;  %v124_v27 = vadd.f32 %v123_v23, %v122_v19  ;;  %v573_v41 = vld [vmem:[#allocation4 + $0x10] sm:$0xc0]  ;;  %v406_v54 = vld [vmem:[#allocation2] sm:$0x30] }
  0x17   :  { %v99_v28 = vsel %vm90_vm0, %v81_v13, 0.0  ;;  %v100_v29 = vsel %vm90_vm0, %v82_v14, 0.0  ;;  %v113_v30 = vperm.slane %v924_v6, 0  ;;  %v114_v35 = vperm.slane %v924_v6, 1  ;;  %v407_v55 = vld [vmem:[#allocation2 + $0x8] sm:$0x30] }
  0x18   :  { %v96_v32 = vadd.f32 %v95_v18, %v93_v22  ;;  %v101_v33 = vadd.f32 %v100_v29, %v99_v28  ;;  %v102_v34 = vsel %vm94_vm1, %v83_v25, 0.0  ;;  %v126_v36 = vadd.f32 %v125_v24, %v124_v27  ;;  %v972_v60 = vld [vmem:[#allocation2 + $0x10] sm:$0x30]  ;;  %v986_v18 = vld [vmem:[#allocation2] sm:$0xe] }
  0x19   :  { %v115_v37 = vperm.slane %v924_v6, 2  ;;  %v129_v38 = vsel %vm90_vm0, %v113_v30, 0.0  ;;  %v961_v39 = vmul.f32 %v918_v3, %v402_v15  ;;  %v130_v43 = vsel %vm90_vm0, %v114_v35, 0.0  ;;  %v412_v22 = vld [vmem:[#allocation4] sm:$0x30] }
  0x1a   :  { %97 = vadd.xlane.f32.xlu0 %v96_v32  ;;  %v103_v42 = vadd.f32 %v102_v34, %v101_v33  ;;  %v577_v44 = vsub.f32 %v565_v20, %v571_v26  ;;  %v578_v45 = vsub.f32 %v566_v21, %v572_v31  ;;  %127 = vadd.xlane.f32.xlu2 %v126_v36  ;;  %vm599_vm7 = vcmask 523270   ;;  %v990_v21 = vld [vmem:[#allocation2 + $0x8] sm:$0xe]  ;;  %v413_v24 = vld [vmem:[#allocation4 + $0x8] sm:$0x30] }
  0x1b   :  { %v131_v46 = vadd.f32 %v130_v43, %v129_v38  ;;  %v132_v47 = vsel %vm94_vm1, %v115_v37, 0.0  ;;  %v510_v48 = vperm.slane %v961_v39, 0  ;;  %v511_v49 = vperm.slane %v961_v39, 1  ;;  %v993_v28 = vld [vmem:[#allocation2 + $0x10] sm:$0xe] }
  0x1c   :  { %104 = vadd.xlane.f32.xlu1 %v103_v42  ;;  %v512_v50 = vperm.slane %v961_v39, 2  ;;  %v579_v51 = vsub.f32 %v567_v40, %v573_v41  ;;  %v583_v52 = vmul.f32 %v577_v44, %v577_v44  ;;  %v584_v53 = vmul.f32 %v578_v45, %v578_v45  ;;  %v414_v40 = vld [vmem:[#allocation4 + $0x10] sm:$0x30] }
  0x1d   :  { %v133_v56 = vadd.f32 %v132_v47, %v131_v46  ;;  %v436_v61 = vand.u32 2147483647, %v406_v54  ;;  %v437_v62 = vand.u32 2147483647, %v407_v55  ;;  %v438_v10 = vand.u32 2147483647, %v972_v60 }
  0x1e   :  { %v585_v57 = vmul.f32 %v579_v51, %v579_v51  ;;  %v589_v58 = vmul.f32 %v583_v52, %v510_v48  ;;  %v590_v59 = vmul.f32 %v584_v53, %v511_v49  ;;  %v287_v30 = vand.u32 2147483647, %v986_v18  ;;  %v403_v46 = vld [vmem:[#allocation6 + $0x3] sm:$0x7]  ;;  %v568_v51 = vld [vmem:[#allocation2 + $0x18] sm:$0xc0] }
  0x1f   :  { %v980_v12 = vsub.f32 0.0, %v436_v61  ;;  %v982_v15 = vsub.f32 0.0, %v437_v62  ;;  %v984_v17 = vsub.f32 0.0, %v438_v10  ;;  %v288_v31 = vand.u32 2147483647, %v990_v21 }
  0x20   :  { %v591_v63 = vmul.f32 %v585_v57, %v512_v50  ;;  %v596_v0 = vsel %vm595_vm6, %v589_v58, 0.0  ;;  %v597_v1 = vsel %vm595_vm6, %v590_v59, 0.0  ;;  %v418_v32 = vmax.f32 %v406_v54, 0.0  ;;  %v569_v52 = vld [vmem:[#allocation2 + $0x20] sm:$0xc0] }
  0x21   :  { %v598_v2 = vadd.f32 %v597_v1, %v596_v0  ;;  %v454_v19 = vand.u32 2147483647, %v980_v12  ;;  %v455_v20 = vand.u32 2147483647, %v982_v15  ;;  %v456_v23 = vand.u32 2147483647, %v984_v17 }
  0x22   :  { %134 = vadd.xlane.f32.xlu0 %v133_v56  ;;  %v600_v11 = vsel %vm599_vm7, %v591_v63, 0.0  ;;  %v419_v35 = vmax.f32 %v407_v55, 0.0  ;;  %v289_v37 = vand.u32 2147483647, %v993_v28  ;;  %v998_v38 = vsub.f32 0.0, %v287_v30 }
  0x23   :  { %v601_v16 = vadd.f32 %v600_v11, %v598_v2  ;;  %v460_v26 = vsub.f32 0.0, %v454_v19  ;;  %v461_v27 = vsub.f32 0.0, %v455_v20  ;;  %v462_v29 = vsub.f32 0.0, %v456_v23  ;;  %v570_v57 = vld [vmem:[#allocation2 + $0x28] sm:$0xc0] }
  0x24   :  { %v424_v41 = vmul.f32 %v412_v22, %v406_v54  ;;  %v425_v42 = vmul.f32 %v413_v24, %v407_v55  ;;  %v1000_v43 = vsub.f32 0.0, %v288_v31  ;;  %v1002_v44 = vsub.f32 0.0, %v289_v37  ;;  %v574_v63 = vld [vmem:[#allocation4 + $0x18] sm:$0xc0]  ;;  %v575_v0 = vld [vmem:[#allocation4 + $0x20] sm:$0xc0] }
  0x25   :  { %602 = vadd.xlane.f32.xlu2 %v601_v16  ;;  %v466_v33 = vmul.f32 1.442695, %v460_v26  ;;  %v468_v34 = vmul.f32 1.442695, %v461_v27  ;;  %v470_v36 = vmul.f32 1.442695, %v462_v29  ;;  %v426_v56 = vmul.f32 %v414_v40, %v972_v60 }
  0x26   :  { %v305_v45 = vand.u32 2147483647, %v998_v38  ;;  %v306_v47 = vand.u32 2147483647, %v1000_v43  ;;  %v420_v53 = vmax.f32 %v972_v60, 0.0  ;;  %v1009_v58 = vsub.f32 %v418_v32, %v424_v41 }
  0x27   :  { %739 = vpow2.f32 %v466_v33  ;;  %v307_v54 = vand.u32 2147483647, %v1002_v44  ;;  %v1011_v59 = vsub.f32 %v419_v35, %v425_v42  ;;  %v1014_v62 = vmul.f32 %v922_v5, %v403_v46  ;;  %v576_v10 = vld [vmem:[#allocation4 + $0x28] sm:$0xc0]  ;;  %v263_v37 = vld [vmem:[#allocation4] sm:$0xe] }
  0x28   :  { %741 = vpow2.f32 %v468_v34  ;;  %v311_v55 = vsub.f32 0.0, %v305_v45  ;;  %v312_v61 = vsub.f32 0.0, %v306_v47  ;;  %v580_v11 = vsub.f32 %v568_v51, %v574_v63  ;;  %v264_v40 = vld [vmem:[#allocation4 + $0x8] sm:$0xe]  ;;  %v265_v63 = vld [vmem:[#allocation4 + $0x10] sm:$0xe] }
  0x29   :  { %743 = vpow2.f32 %v470_v36  ;;  %v313_v1 = vsub.f32 0.0, %v307_v54  ;;  %v581_v16 = vsub.f32 %v569_v52, %v575_v0  ;;  %v513_v20 = vperm.slane %v1014_v62, 0  ;;  %v1030_v52 = vld [vmem:[#allocation2 + $0x18] sm:$0x30] }
  0x2a   :  { %v317_v2 = vmul.f32 1.442695, %v311_v55  ;;  %v319_v19 = vmul.f32 1.442695, %v312_v61  ;;  %v514_v22 = vperm.slane %v1014_v62, 1  ;;  %v515_v23 = vperm.slane %v1014_v62, 2 }
  0x2b   :  { %v321_v27 = vmul.f32 1.442695, %v313_v1  ;;  %v582_v29 = vsub.f32 %v570_v57, %v576_v10  ;;  %v586_v32 = vmul.f32 %v580_v11, %v580_v11  ;;  %v587_v33 = vmul.f32 %v581_v16, %v581_v16  ;;  %v1037_v57 = vld [vmem:[#allocation2 + $0x28] sm:$0x30] }
  0x2c   :  { %745 = vpow2.f32 %v317_v2  ;;  %v1019_v34 = vsub.f32 %v420_v53, %v426_v56  ;;  %v269_v41 = vmax.f32 %v986_v18, 0.0  ;;  %v448_v46 = vmax.f32 %v980_v12, 0.0  ;;  %v1032_v53 = vld [vmem:[#allocation2 + $0x20] sm:$0x30] }
  0x2d   :  { %v740_v60 = vpop.eup %739  ;;  %747 = vpow2.f32 %v319_v19  ;;  %v588_v36 = vmul.f32 %v582_v29, %v582_v29  ;;  %v592_v42 = vmul.f32 %v586_v32, %v513_v20  ;;  %v593_v45 = vmul.f32 %v587_v33, %v514_v22 }
  0x2e   :  { %v742_v24 = vpop.eup %741  ;;  %v478_v26 = vadd.f32 1.0, %v740_v60  ;;  %v270_v47 = vmax.f32 %v990_v21, 0.0  ;;  %v449_v56 = vmax.f32 %v982_v15, 0.0  ;;  %v450_v61 = vmax.f32 %v984_v17, 0.0 }
  0x2f   :  { %v744_v30 = vpop.eup %743  ;;  %v479_v31 = vadd.f32 1.0, %v742_v24  ;;  %v594_v51 = vmul.f32 %v588_v36, %v515_v23  ;;  %v604_v54 = vsel %vm595_vm6, %v592_v42, 0.0  ;;  %v605_v55 = vsel %vm595_vm6, %v593_v45, 0.0 }
  0x30   :  { %v480_v35 = vadd.f32 1.0, %v744_v30  ;;  %749 = vlog2.f32 %v478_v26  ;;  %vm528_vm8 = vcmask 1045508   ;;  %v275_v0 = vmul.f32 %v263_v37, %v986_v18 }
  0x31   :  { %751 = vlog2.f32 %v479_v31  ;;  %v606_v1 = vadd.f32 %v605_v55, %v604_v54  ;;  %v607_v2 = vsel %vm599_vm7, %v594_v51, 0.0  ;;  %v276_v15 = vmul.f32 %v264_v40, %v990_v21 }
  0x32   :  { %753 = vlog2.f32 %v480_v35  ;;  %v746_v12 = vpop.eup %745  ;;  %v439_v16 = vand.u32 2147483647, %v1030_v52  ;;  %v440_v60 = vand.u32 2147483647, %v1032_v53  ;;  %vm532_vm9 = vcmask 521220  }
  0x33   :  { %755 = vpow2.f32 %v321_v27  ;;  %v748_v10 = vpop.eup %747  ;;  %v329_v11 = vadd.f32 1.0, %v746_v12  ;;  %v271_v24 = vmax.f32 %v993_v28, 0.0  ;;  %v608_v26 = vadd.f32 %v607_v2, %v606_v1 }
  0x34   :  { %v330_v17 = vadd.f32 1.0, %v748_v10  ;;  %v441_v27 = vand.u32 2147483647, %v1037_v57  ;;  %v1047_v30 = vsub.f32 0.0, %v439_v16  ;;  %v1049_v31 = vsub.f32 0.0, %v440_v60 }
  0x35   :  { %757 = vlog2.f32 %v329_v11  ;;  %v277_v33 = vmul.f32 %v265_v63, %v993_v28  ;;  %609 = vadd.xlane.f32.xlu2 %v608_v26  ;;  %v281_v42 = vsub.f32 %v269_v41, %v275_v0  ;;  %v282_v45 = vsub.f32 %v270_v47, %v276_v15 }
  0x36   :  { %v750_v19 = vpop.eup %749  ;;  %759 = vlog2.f32 %v330_v17  ;;  %v1052_v35 = vsub.f32 0.0, %v441_v27  ;;  %v299_v54 = vmax.f32 %v998_v38, 0.0  ;;  %v457_v12 = vand.u32 2147483647, %v1047_v30 }
  0x37   :  { %v752_v18 = vpop.eup %751  ;;  %v485_v29 = vmul.f32 0.6931472, %v750_v19  ;;  %v458_v28 = vand.u32 2147483647, %v1049_v31  ;;  %v300_v11 = vmax.f32 %v1000_v43, 0.0  ;;  %v301_v15 = vmax.f32 %v1002_v44, 0.0 }
  0x38   :  { %v754_v21 = vpop.eup %753  ;;  %v487_v32 = vmul.f32 0.6931472, %v752_v18  ;;  %v459_v63 = vand.u32 2147483647, %v1052_v35  ;;  %v463_v41 = vsub.f32 0.0, %v457_v12  ;;  %vm365_vm10 = vcmask 1043457  }
  0x39   :  { %v756_v36 = vpop.eup %755  ;;  %v489_v37 = vmul.f32 0.6931472, %v754_v21  ;;  %v496_v40 = vadd.f32 %v485_v29, %v448_v46  ;;  %v1072_v44 = vld [vmem:[#allocation2 + $0x18] sm:$0xe]  ;;  %v1074_v29 = vld [vmem:[#allocation2 + $0x20] sm:$0xe] }
  0x3a   :  { %v497_v51 = vadd.f32 %v487_v32, %v449_v56  ;;  %v331_v55 = vadd.f32 1.0, %v756_v36  ;;  %v464_v56 = vsub.f32 0.0, %v458_v28  ;;  %v1076_v32 = vld [vmem:[#allocation2 + $0x28] sm:$0xe]  ;;  %v291_v12 = vand.u32 2147483647, %v1074_v29 }
  0x3b   :  { %v498_v1 = vadd.f32 %v489_v37, %v450_v61  ;;  %v502_v2 = vadd.f32 %v496_v40, %v1009_v58  ;;  %v758_v46 = vpop.eup %757  ;;  %v465_v61 = vsub.f32 0.0, %v459_v63  ;;  %vm369_vm11 = vcmask 519169  }
  0x3c   :  { %v503_v10 = vadd.f32 %v497_v51, %v1011_v59  ;;  %761 = vlog2.f32 %v331_v55  ;;  %v760_v0 = vpop.eup %759  ;;  %v336_v16 = vmul.f32 0.6931472, %v758_v46  ;;  %v472_v59 = vmul.f32 1.442695, %v463_v41 }
  0x3d   :  { %v504_v47 = vadd.f32 %v498_v1, %v1019_v34  ;;  %v522_v38 = vmul.f32 %v510_v48, %v502_v2  ;;  %v338_v19 = vmul.f32 0.6931472, %v760_v0  ;;  %v474_v34 = vmul.f32 1.442695, %v464_v56  ;;  %v415_v56 = vld [vmem:[#allocation4 + $0x18] sm:$0x30] }
  0x3e   :  { %v523_v58 = vmul.f32 %v511_v49, %v503_v10  ;;  %v347_v48 = vadd.f32 %v336_v16, %v299_v54  ;;  %763 = vpow2.f32 %v472_v59  ;;  %v476_v26 = vmul.f32 1.442695, %v465_v61  ;;  %v1078_v51 = vld [vmem:[#allocation2] ss:$8 sm:$0x7] }
  0x3f   :  { %v524_v43 = vmul.f32 %v512_v50, %v504_v47  ;;  %v529_v60 = vsel %vm528_vm8, %v522_v38, 0.0  ;;  %v348_v49 = vadd.f32 %v338_v19, %v300_v11  ;;  %765 = vpow2.f32 %v474_v34  ;;  %v416_v16 = vld [vmem:[#allocation4 + $0x20] sm:$0x30] }
  0x40   :  { %v530_v17 = vsel %vm528_vm8, %v523_v58, 0.0  ;;  %v283_v50 = vsub.f32 %v271_v24, %v277_v33  ;;  %v353_v21 = vadd.f32 %v347_v48, %v281_v42  ;;  %767 = vpow2.f32 %v476_v26  ;;  %v1098_v58 = vld [vmem:[#allocation2 + $0x18] ss:$8 sm:$0x7]  ;;  %v417_v48 = vld [vmem:[#allocation4 + $0x28] sm:$0x30] }
  0x41   :  { %v531_v27 = vadd.f32 %v530_v17, %v529_v60  ;;  %v533_v18 = vsel %vm532_vm9, %v524_v43, 0.0  ;;  %v354_v40 = vadd.f32 %v348_v49, %v282_v45  ;;  %v290_v55 = vand.u32 2147483647, %v1072_v44 }
  0x42   :  { %v762_v39 = vpop.eup %761  ;;  %v359_v54 = vmul.f32 %v353_v21, %v78_v7  ;;  %v421_v33 = vmax.f32 %v1030_v52, 0.0  ;;  %v292_v42 = vand.u32 2147483647, %v1076_v32  ;;  %v1091_v63 = vsub.f32 0.0, %v291_v12 }
  0x43   :  { %v534_v36 = vadd.f32 %v533_v18, %v531_v27  ;;  %v340_v37 = vmul.f32 0.6931472, %v762_v39  ;;  %v360_v24 = vmul.f32 %v354_v40, %v79_v8  ;;  %v1089_v28 = vsub.f32 0.0, %v290_v55 }
  0x44   :  { %v764_v45 = vpop.eup %763  ;;  %v366_v2 = vsel %vm365_vm10, %v359_v54, 0.0  ;;  %v143_v7 = vand.u32 2147483647, %v1078_v51  ;;  %v1095_v47 = vsub.f32 0.0, %v292_v42  ;;  %v422_v61 = vmax.f32 %v1032_v53, 0.0 }
  0x45   :  { %535 = vadd.xlane.f32.xlu1 %v534_v36  ;;  %v349_v1 = vadd.f32 %v340_v37, %v301_v15  ;;  %v766_v10 = vpop.eup %765  ;;  %v367_v41 = vsel %vm365_vm10, %v360_v24, 0.0  ;;  %v481_v46 = vadd.f32 1.0, %v764_v45  ;;  %v423_v59 = vmax.f32 %v1037_v57, 0.0 }
  0x46   :  { %v768_v8 = vpop.eup %767  ;;  %v368_v38 = vadd.f32 %v367_v41, %v366_v2  ;;  %v482_v0 = vadd.f32 1.0, %v766_v10  ;;  %v308_v60 = vand.u32 2147483647, %v1089_v28  ;;  %v309_v19 = vand.u32 2147483647, %v1091_v63 }
  0x47   :  { %v355_v11 = vadd.f32 %v349_v1, %v283_v50  ;;  %v483_v43 = vadd.f32 1.0, %v768_v8  ;;  %769 = vlog2.f32 %v481_v46  ;;  %v310_v34 = vand.u32 2147483647, %v1095_v47 }
  0x48   :  { %771 = vlog2.f32 %v482_v0  ;;  %v427_v26 = vmul.f32 %v415_v56, %v1030_v52  ;;  %v145_v27 = vsub.f32 0.0, %v143_v7  ;;  %v314_v18 = vsub.f32 0.0, %v308_v60 }
  0x49   :  { %v361_v15 = vmul.f32 %v355_v11, %v80_v9  ;;  %773 = vlog2.f32 %v483_v43  ;;  %v315_v49 = vsub.f32 0.0, %v309_v19  ;;  %v316_v39 = vsub.f32 0.0, %v310_v34 }
  0x4a   :  { %v428_v50 = vmul.f32 %v416_v16, %v1032_v53  ;;  %v451_v21 = vmax.f32 %v1047_v30, 0.0  ;;  %v147_v36 = vmul.f32 1.442695, %v145_v27  ;;  %v144_v37 = vand.u32 2147483647, %v1098_v58 }
  0x4b   :  { %v370_v17 = vsel %vm369_vm11, %v361_v15, 0.0  ;;  %v429_v40 = vmul.f32 %v417_v48, %v1037_v57  ;;  %v323_v54 = vmul.f32 1.442695, %v314_v18  ;;  %v325_v55 = vmul.f32 1.442695, %v315_v49 }
  0x4c   :  { %v371_v9 = vadd.f32 %v370_v17, %v368_v38  ;;  %v327_v12 = vmul.f32 1.442695, %v316_v39  ;;  %v452_v1 = vmax.f32 %v1049_v31, 0.0  ;;  %775 = vpow2.f32 %v147_v36  ;;  %v266_v27 = vld [vmem:[#allocation4 + $0x18] sm:$0xe] }
  0x4d   :  { %v770_v52 = vpop.eup %769  ;;  %v146_v24 = vsub.f32 0.0, %v144_v37  ;;  %v433_v45 = vsub.f32 %v421_v33, %v427_v26  ;;  %v453_v53 = vmax.f32 %v1052_v35, 0.0  ;;  %777 = vpow2.f32 %v323_v54  ;;  %v267_v49 = vld [vmem:[#allocation4 + $0x20] sm:$0xe]  ;;  %v268_v39 = vld [vmem:[#allocation4 + $0x28] sm:$0xe] }
  0x4e   :  { %372 = vadd.xlane.f32.xlu0 %v371_v9  ;;  %v772_v42 = vpop.eup %771  ;;  %v491_v2 = vmul.f32 0.6931472, %v770_v52  ;;  %v434_v7 = vsub.f32 %v422_v61, %v428_v50  ;;  %779 = vpow2.f32 %v325_v55  ;;  %v435_v57 = vsub.f32 %v423_v59, %v429_v40 }
  0x4f   :  { %v774_v30 = vpop.eup %773  ;;  %v493_v10 = vmul.f32 0.6931472, %v772_v42  ;;  %v149_v11 = vmul.f32 1.442695, %v146_v24  ;;  %781 = vpow2.f32 %v327_v12  ;;  %v278_v50 = vmul.f32 %v266_v27, %v1072_v44 }
  0x50   :  { %v495_v41 = vmul.f32 0.6931472, %v774_v30  ;;  %v499_v46 = vadd.f32 %v491_v2, %v451_v21  ;;  %v273_v21 = vmax.f32 %v1074_v29, 0.0  ;;  %v279_v36 = vmul.f32 %v267_v49, %v1074_v29 }
  0x51   :  { %v500_v8 = vadd.f32 %v493_v10, %v452_v1  ;;  %783 = vpow2.f32 %v149_v11  ;;  %v141_v37 = vmax.f32 %v1078_v51, 0.0  ;;  %v274_v54 = vmax.f32 %v1076_v32, 0.0 }
  0x52   :  { %v501_v31 = vadd.f32 %v495_v41, %v453_v53  ;;  %v505_v38 = vadd.f32 %v499_v46, %v433_v45  ;;  %v776_v56 = vpop.eup %775  ;;  %v280_v55 = vmul.f32 %v268_v39, %v1076_v32  ;;  %v302_v12 = vmax.f32 %v1089_v28, 0.0 }
  0x53   :  { %v506_v0 = vadd.f32 %v500_v8, %v434_v7  ;;  %v778_v33 = vpop.eup %777  ;;  %v151_v16 = vadd.f32 1.0, %v776_v56  ;;  %v303_v1 = vmax.f32 %v1091_v63, 0.0  ;;  %v304_v45 = vmax.f32 %v1095_v47, 0.0 }
  0x54   :  { %v507_v15 = vadd.f32 %v501_v31, %v435_v57  ;;  %v525_v35 = vmul.f32 %v513_v20, %v505_v38  ;;  %v780_v61 = vpop.eup %779  ;;  %v332_v59 = vadd.f32 1.0, %v778_v33  ;;  %v285_v2 = vsub.f32 %v273_v21, %v279_v36 }
  0x55   :  { %v526_v43 = vmul.f32 %v514_v22, %v506_v0  ;;  %v782_v60 = vpop.eup %781  ;;  %v333_v17 = vadd.f32 1.0, %v780_v61  ;;  %785 = vlog2.f32 %v151_v16  ;;  %v142_v10 = vmax.f32 %v1098_v58, 0.0 }
  0x56   :  { %v527_v19 = vmul.f32 %v515_v23, %v507_v15  ;;  %v537_v34 = vsel %vm528_vm8, %v525_v35, 0.0  ;;  %v334_v9 = vadd.f32 1.0, %v782_v60  ;;  %787 = vlog2.f32 %v332_v59 }
  0x57   :  { %v784_v48 = vpop.eup %783  ;;  %v538_v26 = vsel %vm528_vm8, %v526_v43, 0.0  ;;  %789 = vlog2.f32 %v333_v17  ;;  %v272_v23 = vmax.f32 %v1072_v44, 0.0  ;;  %v286_v57 = vsub.f32 %v274_v54, %v280_v55 }
  0x58   :  { %v539_v20 = vadd.f32 %v538_v26, %v537_v34  ;;  %v540_v18 = vsel %vm532_vm9, %v527_v19, 0.0  ;;  %v152_v22 = vadd.f32 1.0, %v784_v48  ;;  %791 = vlog2.f32 %v334_v9 }
  0x59   :  { %v284_v42 = vsub.f32 %v272_v23, %v278_v50  ;;  %vm691_vm12 = vcmask 0   ;;  %vm694_vm13 = vcmask 8200   ;;  %vm387_vm14 = vcmask 1042432  }
  0x5a   :  { %v541_v62 = vadd.f32 %v540_v18, %v539_v20  ;;  %793 = vlog2.f32 %v152_v22  ;;  %vm550_vm15 = vcmask 1041408   ;;  %vm703_vm2 = vcmask 32800  }
  0x5b   :  { %v786_v40 = vpop.eup %785  ;;  %vm706_vm3 = vcmask 41000   ;;  %vm709_vm4 = vcmask 49200   ;;  %vm712_vm5 = vcmask 57400   ;;  %vm715_vm6 = vcmask 65600  }
  0x5c   :  { %542 = vadd.xlane.f32.xlu1 %v541_v62  ;;  %v788_v52 = vpop.eup %787  ;;  %v154_v24 = vmul.f32 0.6931472, %v786_v40  ;;  %vm718_vm7 = vcmask 73800  }
  0x5d   :  { %v790_v44 = vpop.eup %789  ;;  %v342_v53 = vmul.f32 0.6931472, %v788_v52 }
  0x5e   :  { %v792_v29 = vpop.eup %791  ;;  %v344_v30 = vmul.f32 0.6931472, %v790_v44  ;;  %v157_v7 = vadd.f32 %v154_v24, %v141_v37 }
  0x5f   :  { %v346_v32 = vmul.f32 0.6931472, %v792_v29  ;;  %v350_v41 = vadd.f32 %v342_v53, %v302_v12 }
  0x60   :  { %v794_v11 = vpop.eup %793  ;;  %v351_v28 = vadd.f32 %v344_v30, %v303_v1  ;;  %v159_v46 = vsub.f32 %v1078_v51, %v157_v7  ;;  %v161_v16 = vsub.f32 0.0, %v157_v7 }
  0x61   :  { %v156_v63 = vmul.f32 0.6931472, %v794_v11  ;;  %v352_v8 = vadd.f32 %v346_v32, %v304_v45  ;;  %v356_v31 = vadd.f32 %v350_v41, %v284_v42 }
  0x62   :  { %v357_v38 = vadd.f32 %v351_v28, %v285_v2  ;;  %v163_v56 = vmul.f32 1.442695, %v159_v46  ;;  %v171_v34 = vmax.f32 %v159_v46, -6.931472  ;;  %v175_v17 = vmax.f32 %v161_v16, -6.931472 }
  0x63   :  { %v158_v47 = vadd.f32 %v156_v63, %v142_v10  ;;  %v358_v0 = vadd.f32 %v352_v8, %v286_v57  ;;  %v362_v33 = vmul.f32 %v356_v31, %v81_v13 }
  0x64   :  { %v363_v15 = vmul.f32 %v357_v38, %v82_v14  ;;  %795 = vpow2.f32 %v163_v56  ;;  %v173_v20 = vmin.f32 %v171_v34, -0.0009770397  ;;  %v177_v18 = vmin.f32 %v175_v17, -0.0009770397 }
  0x65   :  { %v160_v35 = vsub.f32 %v1098_v58, %v158_v47  ;;  %v364_v51 = vmul.f32 %v358_v0, %v83_v25  ;;  %v374_v61 = vsel %vm365_vm10, %v362_v33, 0.0  ;;  %v162_v13 = vsub.f32 0.0, %v158_v47 }
  0x66   :  { %v375_v43 = vsel %vm365_vm10, %v363_v15, 0.0 }
  0x67   :  { %v165_v59 = vmul.f32 1.442695, %v160_v35  ;;  %v376_v60 = vadd.f32 %v375_v43, %v374_v61  ;;  %v377_v19 = vsel %vm369_vm11, %v364_v51, 0.0  ;;  %v176_v9 = vmax.f32 %v162_v13, -6.931472 }
  0x68   :  { %v172_v53 = vmax.f32 %v160_v35, -6.931472 }
  0x69   :  { %797 = vpow2.f32 %v165_v59  ;;  %v378_v14 = vadd.f32 %v377_v19, %v376_v60  ;;  %v178_v57 = vmin.f32 %v176_v9, -0.0009770397 }
  0x6a   :  { %v796_v48 = vpop.eup %795  ;;  %v174_v63 = vmin.f32 %v172_v53, -0.0009770397 }
  0x6b   :  { %379 = vadd.xlane.f32.xlu0 %v378_v14  ;;  %v1145_v58 = vperm.slane %v796_v48, 0  ;;  %v1147_v26 = vperm.slane %v796_v48, 1  ;;  %v1149_v25 = vperm.slane %v796_v48, 2  ;;  %v167_v27 = vmax.f32 %v796_v48, 0.0009765625 }
  0x6d   :  { %v645_v49 = vsel %vm90_vm0, %v1145_v58, -inf  ;;  %v646_v22 = vsel %vm90_vm0, %v1147_v26, -inf  ;;  %v647_v39 = vsel %vm94_vm1, %v1149_v25, -inf  ;;  %v659_v62 = vsel %vm90_vm0, %v1145_v58, inf }
  0x6e   :  { %v648_v50 = vmax.f32 %v645_v49, %v647_v39  ;;  %v660_v21 = vsel %vm90_vm0, %v1147_v26, inf  ;;  %v661_v36 = vsel %vm94_vm1, %v1149_v25, inf  ;;  %v169_v37 = vmin.f32 %v167_v27, 0.99902344 }
  0x6f   :  { %v798_v23 = vpop.eup %797  ;;  %v662_v40 = vmin.f32 %v659_v62, %v661_v36 }
  0x70   :  { %v168_v54 = vmax.f32 %v798_v23, 0.0009765625  ;;  %v1163_v55 = vperm.slane %v798_v23, 0  ;;  %v1165_v12 = vperm.slane %v798_v23, 1  ;;  %v649_v52 = vmax.f32 %v648_v50, %v646_v22 }
  0x71   :  { %v1167_v1 = vperm.slane %v798_v23, 2  ;;  %v179_v24 = vsub.f32 1.0, %v169_v37  ;;  %v219_v44 = vmul.f32 -0.5, %v169_v37  ;;  %v663_v42 = vmin.f32 %v662_v40, %v660_v21 }
  0x72   :  { %v170_v45 = vmin.f32 %v168_v54, 0.99902344  ;;  %v652_v29 = vsel %vm90_vm0, %v1163_v55, -inf  ;;  %650 = vmax.xlane.f32.xlu2 %v649_v52  ;;  %v653_v2 = vsel %vm90_vm0, %v1165_v12, -inf  ;;  %v666_v52 = vsel %vm90_vm0, %v1163_v55, inf }
  0x73   :  { %v654_v30 = vsel %vm94_vm1, %v1167_v1, -inf  ;;  %v181_v7 = vmul.f32 -0.5, %v179_v24  ;;  %v221_v10 = vmul.f32 %v219_v44, %v169_v37  ;;  %664 = vmin.xlane.f32.xlu1 %v663_v42  ;;  %v674_v37 = vsel %vm90_vm0, %v1147_v26, 0.0 }
  0x74   :  { %v180_v11 = vsub.f32 1.0, %v170_v45  ;;  %v220_v32 = vmul.f32 -0.5, %v170_v45  ;;  %v655_v41 = vmax.f32 %v652_v29, %v654_v30  ;;  %v676_v26 = vsel %vm94_vm1, %v1149_v25, 0.0 }
  0x75   :  { %v183_v28 = vmul.f32 %v181_v7, %v179_v24  ;;  %v223_v46 = vmul.f32 %v221_v10, %v177_v18  ;;  %v668_v24 = vsel %vm94_vm1, %v1167_v1, inf }
  0x76   :  { %v182_v8 = vmul.f32 -0.5, %v180_v11  ;;  %v222_v31 = vmul.f32 %v220_v32, %v170_v45  ;;  %v656_v38 = vmax.f32 %v655_v41, %v653_v2  ;;  %v669_v29 = vmin.f32 %v666_v52, %v668_v24 }
  0x77   :  { %v185_v56 = vmul.f32 %v183_v28, %v173_v20  ;;  %v225_v47 = vmul.f32 %v920_v4, %v223_v46  ;;  %v667_v2 = vsel %vm90_vm0, %v1165_v12, inf  ;;  %v681_v32 = vsel %vm90_vm0, %v1165_v12, 0.0 }
  0x78   :  { %v184_v0 = vmul.f32 %v182_v8, %v180_v11  ;;  %v224_v33 = vmul.f32 %v222_v31, %v178_v57  ;;  %657 = vmax.xlane.f32.xlu0 %v656_v38  ;;  %v670_v11 = vmin.f32 %v669_v29, %v667_v2  ;;  %v680_v57 = vsel %vm90_vm0, %v1163_v55, 0.0 }
  0x79   :  { %v187_v15 = vmul.f32 %v918_v3, %v185_v56  ;;  %v229_v35 = vperm.slane %v225_v47, 0  ;;  %v230_v16 = vperm.slane %v225_v47, 1  ;;  %v231_v59 = vperm.slane %v225_v47, 2 }
  0x7a   :  { %v186_v51 = vmul.f32 %v184_v0, %v174_v63  ;;  %v226_v61 = vmul.f32 %v924_v6, %v224_v33  ;;  %v673_v3 = vsel %vm90_vm0, %v1145_v58, 0.0  ;;  %v682_v55 = vadd.f32 %v681_v32, %v680_v57 }
  0x7b   :  { %v191_v43 = vperm.slane %v187_v15, 0  ;;  %v241_v60 = vsel %vm90_vm0, %v229_v35, 0.0  ;;  %v192_v4 = vperm.slane %v187_v15, 1  ;;  %v193_v14 = vperm.slane %v187_v15, 2 }
  0x7c   :  { %v188_v19 = vmul.f32 %v922_v5, %v186_v51  ;;  %v232_v13 = vperm.slane %v226_v61, 0  ;;  %v233_v34 = vperm.slane %v226_v61, 1  ;;  %v234_v17 = vperm.slane %v226_v61, 2 }
  0x7d   :  { %v242_v48 = vsel %vm90_vm0, %v230_v16, 0.0  ;;  %v203_v5 = vsel %vm90_vm0, %v191_v43, 0.0  ;;  %v204_v21 = vsel %vm90_vm0, %v192_v4, 0.0  ;;  %v244_v36 = vsel %vm94_vm1, %v231_v59, 0.0 }
  0x7e   :  { %v194_v27 = vperm.slane %v188_v19, 0  ;;  %v195_v9 = vperm.slane %v188_v19, 1  ;;  %v196_v20 = vperm.slane %v188_v19, 2  ;;  %v248_v6 = vsel %vm90_vm0, %v232_v13, 0.0 }
  0x7f   :  { %v249_v18 = vsel %vm90_vm0, %v233_v34, 0.0  ;;  %v251_v49 = vsel %vm94_vm1, %v234_v17, 0.0  ;;  %v243_v22 = vadd.f32 %v242_v48, %v241_v60  ;;  %v205_v42 = vadd.f32 %v204_v21, %v203_v5 }
  0x80   :  { %v210_v39 = vsel %vm90_vm0, %v194_v27, 0.0  ;;  %v211_v62 = vsel %vm90_vm0, %v195_v9, 0.0  ;;  %v213_v23 = vsel %vm94_vm1, %v196_v20, 0.0  ;;  %v250_v50 = vadd.f32 %v249_v18, %v248_v6 }
  0x81   :  { %v212_v58 = vadd.f32 %v211_v62, %v210_v39  ;;  %v245_v54 = vadd.f32 %v244_v36, %v243_v22  ;;  %v675_v45 = vadd.f32 %v674_v37, %v673_v3  ;;  %v206_v53 = vsel %vm94_vm1, %v193_v14, 0.0 }
  0x82   :  { %v252_v40 = vadd.f32 %v251_v49, %v250_v50  ;;  %v207_v30 = vadd.f32 %v206_v53, %v205_v42  ;;  %v683_v12 = vsel %vm94_vm1, %v1167_v1, 0.0  ;;  %vm697_vm0 = vcmask 16400  }
  0x83   :  { %v214_v44 = vadd.f32 %v213_v23, %v212_v58  ;;  %246 = vadd.xlane.f32.xlu0 %v245_v54  ;;  %v677_v7 = vadd.f32 %v676_v26, %v675_v45  ;;  %v684_v28 = vadd.f32 %v683_v12, %v682_v55  ;;  %vm700_vm1 = vcmask 24600  }
  0x84   :  { %253 = vadd.xlane.f32.xlu1 %v252_v40 }
  0x85   :  { %215 = vadd.xlane.f32.xlu2 %v214_v44 }
  0x8b   :  { %678 = vadd.xlane.f32.xlu0 %v677_v7 }
  0x8c   :  { %208 = vadd.xlane.f32.xlu1 %v207_v30 }
  0x8d   :  { %v98_v10 = vpop.xlane.xlu0 %97  ;;  %v128_v25 = vpop.xlane.xlu2 %127  ;;  %671 = vmin.xlane.f32.xlu2 %v670_v11 }
  0x8e   :  { %692 = vst.msk [vmem:[%s1286_s3] sm:$0x1] %vm691_vm12, %v98_v10 }
  0x8f   :  { %695 = vst.msk [vmem:[%s1286_s3] sm:$0x1] %vm694_vm13, %v128_v25  ;;  %v105_v41 = vpop.xlane.xlu1 %104 }
  0x90   :  { %693 = vst.msk [vmem:[%s1286_s3 + $0x1] sm:$0x1] %vm691_vm12, %v105_v41 }
  0x94   :  { %685 = vadd.xlane.f32.xlu1 %v684_v28 }
  0x95   :  { %v135_v46 = vpop.xlane.xlu0 %134 }
  0x96   :  { %696 = vst.msk [vmem:[%s1286_s3 + $0x1] sm:$0x1] %vm694_vm13, %v135_v46 }
  0x98   :  { %v603_v8 = vpop.xlane.xlu2 %602 }
  0x99   :  { %v613_v60 = vrot.slane %v603_v8, 6 }
  0x9b   :  { %v617_v14 = vsel %vm550_vm15, %v613_v60, 0.0 }
  0x9c   :  { %v618_v6 = vrot.slane %v617_v14, 4 }
  0x9e   :  { %v619_v23 = vadd.f32 %v618_v6, %v617_v14 }
  0xa0   :  { %v620_v54 = vrot.slane %v619_v23, 2 }
  0xa2   :  { %v621_v26 = vadd.f32 %v620_v54, %v619_v23 }
  0xa4   :  { %v622_v57 = vrot.slane %v621_v26, 1 }
  0xa6   :  { %v623_v55 = vadd.f32 %v622_v57, %v621_v26 }
  0xa8   :  { %v610_v56 = vpop.xlane.xlu2 %609 }
  0xa9   :  { %v614_v33 = vrot.slane %v610_v56, 6 }
  0xab   :  { %v624_v51 = vsel %vm550_vm15, %v614_v33, 0.0 }
  0xac   :  { %v625_v19 = vrot.slane %v624_v51, 4 }
  0xae   :  { %v626_v48 = vadd.f32 %v625_v19, %v624_v51 }
  0xb0   :  { %v627_v5 = vrot.slane %v626_v48, 2 }
  0xb2   :  { %v628_v21 = vadd.f32 %v627_v5, %v626_v48 }
  0xb4   :  { %v629_v24 = vrot.slane %v628_v21, 1 }
  0xb6   :  { %v630_v30 = vadd.f32 %v629_v24, %v628_v21 }
  0xb8   :  { %v536_v63 = vpop.xlane.xlu1 %535 }
  0xb9   :  { %v546_v43 = vrot.slane %v536_v63, 4 }
  0xbb   :  { %v551_v17 = vsel %vm550_vm15, %v546_v43, 0.0 }
  0xbc   :  { %v552_v9 = vrot.slane %v551_v17, 4 }
  0xbe   :  { %v553_v62 = vadd.f32 %v552_v9, %v551_v17 }
  0xc0   :  { %v554_v40 = vrot.slane %v553_v62, 2 }
  0xc1   :  { %v373_v31 = vpop.xlane.xlu0 %372 }
  0xc2   :  { %v383_v61 = vrot.slane %v373_v31, 1  ;;  %v555_v29 = vadd.f32 %v554_v40, %v553_v62 }
  0xc4   :  { %v388_v34 = vsel %vm387_vm14, %v383_v61, 0.0  ;;  %v556_v11 = vrot.slane %v555_v29, 1 }
  0xc5   :  { %v389_v27 = vrot.slane %v388_v34, 4 }
  0xc6   :  { %v557_v41 = vadd.f32 %v556_v11, %v555_v29 }
  0xc7   :  { %v390_v39 = vadd.f32 %v389_v27, %v388_v34 }
  0xc9   :  { %v391_v37 = vrot.slane %v390_v39, 2 }
  0xcb   :  { %v392_v45 = vadd.f32 %v391_v37, %v390_v39 }
  0xcd   :  { %v393_v7 = vrot.slane %v392_v45, 1 }
  0xcf   :  { %v543_v38 = vpop.xlane.xlu1 %542  ;;  %v394_v25 = vadd.f32 %v393_v7, %v392_v45 }
  0xd0   :  { %v547_v47 = vrot.slane %v543_v38, 4 }
  0xd2   :  { %v558_v35 = vsel %vm550_vm15, %v547_v47, 0.0 }
  0xd3   :  { %v559_v59 = vrot.slane %v558_v35, 4 }
  0xd5   :  { %v560_v4 = vadd.f32 %v559_v59, %v558_v35 }
  0xd7   :  { %v561_v18 = vrot.slane %v560_v4, 2 }
  0xd9   :  { %v562_v50 = vadd.f32 %v561_v18, %v560_v4 }
  0xdb   :  { %v563_v52 = vrot.slane %v562_v50, 1 }
  0xdd   :  { %v564_v2 = vadd.f32 %v563_v52, %v562_v50 }
  0xde   :  { %v380_v0 = vpop.xlane.xlu0 %379 }
  0xdf   :  { %v384_v15 = vrot.slane %v380_v0, 1 }
  0xe1   :  { %v395_v1 = vsel %vm387_vm14, %v384_v15, 0.0 }
  0xe2   :  { %v396_v16 = vrot.slane %v395_v1, 4 }
  0xe4   :  { %v397_v13 = vadd.f32 %v396_v16, %v395_v1 }
  0xe5   :  { %v651_v49 = vpop.xlane.xlu2 %650 }
  0xe6   :  { %v398_v3 = vrot.slane %v397_v13, 2  ;;  %v665_v20 = vpop.xlane.xlu1 %664 }
  0xe8   :  { %v399_v22 = vadd.f32 %v398_v3, %v397_v13 }
  0xea   :  { %v400_v36 = vrot.slane %v399_v22, 1 }
  0xeb   :  { %v658_v58 = vpop.xlane.xlu0 %657 }
  0xec   :  { %v401_v44 = vadd.f32 %v400_v36, %v399_v22 }
  0xf6   :  { %v247_v10 = vpop.xlane.xlu0 %246 }
  0xf7   :  { %v254_v42 = vpop.xlane.xlu1 %253 }
  0xf8   :  { %v216_v53 = vpop.xlane.xlu2 %215 }
  0xf9   :  { %699 = vst.msk [vmem:[%s1286_s3 + $0x1] sm:$0x1] %vm697_vm0, %v216_v53 }
  0xfa   :  { %702 = vst.msk [vmem:[%s1286_s3 + $0x1] sm:$0x1] %vm700_vm1, %v254_v42 }
  0xfb   :  { %705 = vst.msk [vmem:[%s1286_s3 + $0x1] sm:$0x1] %vm703_vm2, %v401_v44 }
  0xfc   :  { %708 = vst.msk [vmem:[%s1286_s3 + $0x1] sm:$0x1] %vm706_vm3, %v564_v2 }
  0xfd   :  { %711 = vst.msk [vmem:[%s1286_s3 + $0x1] sm:$0x1] %vm709_vm4, %v630_v30 }
  0xfe   :  { %714 = vst.msk [vmem:[%s1286_s3 + $0x1] sm:$0x1] %vm712_vm5, %v658_v58  ;;  %v679_v28 = vpop.xlane.xlu0 %678 }
  0xff   :  { %v209_v32 = vpop.xlane.xlu1 %208 }
 0x100   :  { %698 = vst.msk [vmem:[%s1286_s3] sm:$0x1] %vm697_vm0, %v209_v32  ;;  %v672_v12 = vpop.xlane.xlu2 %671 }
 0x101   :  { %701 = vst.msk [vmem:[%s1286_s3] sm:$0x1] %vm700_vm1, %v247_v10 }
 0x102   :  { %704 = vst.msk [vmem:[%s1286_s3] sm:$0x1] %vm703_vm2, %v394_v25 }
 0x103   :  { %707 = vst.msk [vmem:[%s1286_s3] sm:$0x1] %vm706_vm3, %v557_v41 }
 0x104   :  { %710 = vst.msk [vmem:[%s1286_s3] sm:$0x1] %vm709_vm4, %v623_v55 }
 0x105   :  { %717 = vst.msk [vmem:[%s1286_s3 + $0x1] sm:$0x1] %vm715_vm6, %v672_v12 }
 0x106   :  { %713 = vst.msk [vmem:[%s1286_s3] sm:$0x1] %vm712_vm5, %v651_v49 }
 0x107   :  { %v686_v46 = vpop.xlane.xlu1 %685  ;;  %716 = vst.msk [vmem:[%s1286_s3] sm:$0x1] %vm715_vm6, %v665_v20 }
 0x108   :  { %720 = vst.msk [vmem:[%s1286_s3 + $0x1] sm:$0x1] %vm718_vm7, %v686_v46 }
 0x109   :  { %719 = vst.msk [vmem:[%s1286_s3] sm:$0x1] %vm718_vm7, %v679_v28 }
 0x10a   :  { %725 = vsyncpa [#allocation3], 1 }
 0x10b   :  { %726 = vsyncpa [#allocation5], 1 }

</bundles_post_ra>
